<compile_context>
chip_gen: v5e
topology: v5e:2x2
jax: 0.10.0
libtpu: 0.0.40
codegen_flags: <defaults>
</compile_context>

<pallas_src>
import functools

import jax
import jax.numpy as jnp
from jax.experimental import pallas as pl
from jax.experimental.pallas import tpu as pltpu


def _downsample_a_kernel(x_ref, s_ref, o_ref, *, nb, c, f, c_aligned):
    """One grid step: `nb` images, all C channels each.

    x_ref: (nb*C, H*W)      flattened input images   (lane-dense)
    s_ref: (H*W, Ho*Wo)     0/1 selection matrix, bf16 (shared, fetched once)
    o_ref: (nb, 2C, Ho*Wo)  output: [:, :C, :] = subsample, [:, C:, :] = zeros
    """
    x = x_ref[...]
    s = s_ref[...]

    if x.dtype == jnp.float32:
        # Exact 3-chunk bf16 split: x == hi + mid + lo bit-exactly, and each
        # single-pass bf16 dot against the 0/1 selection matrix is exact, so
        # the sum reproduces the f32 gather with 3 MXU passes (vs HIGHEST's 6).
        hi = x.astype(jnp.bfloat16)
        r1 = x - hi.astype(jnp.float32)
        mid = r1.astype(jnp.bfloat16)
        lo = (r1 - mid.astype(jnp.float32)).astype(jnp.bfloat16)
        sub = jnp.dot(hi, s, preferred_element_type=jnp.float32)
        sub = sub + jnp.dot(mid, s, preferred_element_type=jnp.float32)
        sub = sub + jnp.dot(lo, s, preferred_element_type=jnp.float32)
    else:
        # bf16 (or other) inputs: single-pass selection dot, exact for 0/1 S.
        sub = jnp.dot(x, s.astype(x.dtype), preferred_element_type=jnp.float32)

    sub = sub.astype(o_ref.dtype)                      # (nb*C, F)

    # Zero channel half: one dense store of the whole [:, C:, :] slab.
    o_ref[:, c:, :] = jnp.zeros((nb, c, f), dtype=o_ref.dtype)

    if c_aligned:
        # C is sublane-aligned -> (nb*C, F) -> (nb, C, F) is layout-trivial and
        # the real half goes out as one dense store.
        o_ref[:, :c, :] = sub.reshape(nb, c, f)
    else:
        # Misaligned C (tiny models / demo): proven static-slice stores per
        # image; nb is capped in _pick_nb so this unroll stays short.
        for j in range(nb):
            o_ref[j, :c, :] = sub[j * c:(j + 1) * c, :]


def _pick_nb(n, c, bytes_per_image, sublane, target_bytes=4 << 20):
    """Images per grid step.

    Constraints: divisor of n, sublane-aligned block rows (or whole batch),
    ~<= target_bytes of input per step.  Preferences (in order): an even
    number of >=2 grid steps (balanced work for v7x's two TensorCores),
    >=2 steps, nb*C a multiple of 128 (full MXU M-tiles), biggest block.
    """
    divisors = [d for d in range(1, n + 1) if n % d == 0]
    feasible = [d for d in divisors if (d * c) % sublane == 0 or d == n]
    if not feasible:
        feasible = [n]
    candidates = [d for d in feasible if d * bytes_per_image <= target_bytes]
    if not candidates:
        candidates = [min(feasible)]
    if c % sublane != 0:
        # Misaligned-C store path unrolls a per-image loop; keep it short.
        capped = [d for d in candidates if d <= 16]
        if capped:
            candidates = capped

    def score(d):
        steps = n // d
        return (
            1 if (steps >= 2 and steps % 2 == 0) else 0,
            1 if steps >= 2 else 0,
            1 if (d * c) % 128 == 0 else 0,
            d,
        )

    return max(candidates, key=score)


def downsample_a(x):
    """Pallas implementation of DownsampleA.forward (stride fixed to 2).

    (N, C, H, W) -> (N, 2C, ceil(H/2), ceil(W/2)); odd H/W handled like
    PyTorch's AvgPool2d(kernel_size=1, stride=2) (ceil).
    """
    N, C, H, W = x.shape
    Ho, Wo = (H + 1) // 2, (W + 1) // 2
    HW, F = H * W, Ho * Wo

    # 0/1 selection matrix: S[h*W + w, ho*Wo + wo] = 1 iff h == 2*ho, w == 2*wo.
    # Built once by XLA in the wrapper, in bfloat16 (0/1 exact); its BlockSpec
    # index is constant so the pipeline fetches it into VMEM a single time.
    f_idx = jnp.arange(F, dtype=jnp.int32)
    src = (2 * (f_idx // Wo)) * W + 2 * (f_idx % Wo)                  # (F,)
    sel = (jnp.arange(HW, dtype=jnp.int32)[:, None] == src[None, :]
           ).astype(jnp.bfloat16)

    itemsize = jnp.dtype(x.dtype).itemsize
    sublane = max(1, 32 // itemsize)          # 8 for f32, 16 for bf16
    nb = _pick_nb(N, C, C * HW * itemsize, sublane)
    grid = (N // nb,)

    # Explicit scoped-VMEM cap: double-buffered in/out blocks + S + in-kernel
    # temporaries (bf16 chunks + f32 partials), with 1.5x headroom, capped well
    # below v7x's 64 MiB physical VMEM per TensorCore.
    in_block = nb * C * HW * itemsize
    out_block = nb * 2 * C * F * itemsize
    s_bytes = HW * F * 2
    est = (2 * in_block + 2 * out_block + 2 * s_bytes
           + (3 * in_block) // 2 + (3 * out_block) // 2)
    vmem_limit = int(min(48 << 20, max((est * 3) // 2, 8 << 20)))

    kernel = functools.partial(
        _downsample_a_kernel, nb=nb, c=C, f=F,
        c_aligned=(C % sublane == 0))

    out = pl.pallas_call(
        kernel,
        out_shape=jax.ShapeDtypeStruct((N, 2 * C, F), x.dtype),
        grid=grid,
        in_specs=[
            # Contiguous slab of nb images (all channels), lane dim = H*W.
            pl.BlockSpec((nb * C, HW), lambda i: (i, 0)),
            # Shared selection matrix, same block every step -> DMA'd once.
            pl.BlockSpec((HW, F), lambda i: (0, 0)),
        ],
        # Contiguous slab of nb output images; [:, :C, :] real, [:, C:, :] zero.
        out_specs=pl.BlockSpec((nb, 2 * C, F), lambda i: (i, 0, 0)),
        compiler_params=pltpu.CompilerParams(
            dimension_semantics=("parallel",),
            vmem_limit_bytes=vmem_limit,
        ),
    )(x.reshape(N * C, HW), sel)

    # Pure layout plumbing back to NCHW (free reshape of contiguous dims).
    return out.reshape(N, 2 * C, Ho, Wo)


if __name__ == "__main__":
    key = jax.random.PRNGKey(0)
    N, C, H, W = 2, 4, 16, 16
    x = jax.random.normal(key, (N, C, H, W), dtype=jnp.float32)

    fn = jax.jit(downsample_a)
    out = jax.block_until_ready(fn(x))

    # Reference: AvgPool2d(k=1, s=2) == stride-2 subsample, then zero channel pad.
    sub = x[:, :, ::2, ::2]
    ref = jnp.concatenate([sub, jnp.zeros_like(sub)], axis=1)

    assert out.shape == (N, 2 * C, (H + 1) // 2, (W + 1) // 2), out.shape
    assert out.dtype == x.dtype
    assert jnp.allclose(out, ref, atol=1e-6, rtol=0.0), "mismatch vs reference"

    print("KERNEL_OK")
</pallas_src>

<mosaic_0001>
module attributes {stable_mosaic.version = 11 : i64} {
  func.func @_downsample_a_kernel(%arg0: i32, %arg1: memref<8x256xf32, #tpu.memory_space<vmem>>, %arg2: memref<256x64xbf16, #tpu.memory_space<vmem>>, %arg3: memref<2x8x64xf32, #tpu.memory_space<vmem>>) attributes {dimension_semantics = [#tpu.dimension_semantics<parallel>], iteration_bounds = array<i64: 1>, scalar_prefetch = 0 : i64, scratch_operands = 0 : i64, tpu.core_type = #tpu.core_type<tc>, window_params = [{transform_indices = @transform_0, window_bounds = array<i64: 8, 256>}, {pipeline_mode = #tpu.pipeline_mode<synchronous>, transform_indices = @transform_1, window_bounds = array<i64: 256, 64>}, {transform_indices = @transform_2, window_bounds = array<i64: 2, 8, 64>}]} {
    %c0 = arith.constant 0 : index
    %c0_0 = arith.constant 0 : index
    %0 = vector.load %arg1[%c0, %c0_0] : memref<8x256xf32, #tpu.memory_space<vmem>>, vector<8x256xf32>
    %c0_1 = arith.constant 0 : index
    %c0_2 = arith.constant 0 : index
    %1 = vector.load %arg2[%c0_1, %c0_2] : memref<256x64xbf16, #tpu.memory_space<vmem>>, vector<256x64xbf16>
    %2 = arith.truncf %0 : vector<8x256xf32> to vector<8x256xbf16>
    %3 = arith.extf %2 : vector<8x256xbf16> to vector<8x256xf32>
    %4 = arith.subf %0, %3 : vector<8x256xf32>
    %5 = arith.truncf %4 : vector<8x256xf32> to vector<8x256xbf16>
    %6 = arith.extf %5 : vector<8x256xbf16> to vector<8x256xf32>
    %7 = arith.subf %4, %6 : vector<8x256xf32>
    %8 = arith.truncf %7 : vector<8x256xf32> to vector<8x256xbf16>
    %cst = arith.constant dense<0.000000e+00> : vector<8x64xf32>
    %9 = tpu.matmul %2, %1, %cst {dimension_numbers = #tpu.dot_dimension_numbers<[1], [0], [0], [1], [0, 0, 1, 1], [], []>} : vector<8x256xbf16>, vector<256x64xbf16>, vector<8x64xf32> -> vector<8x64xf32>
    %cst_3 = arith.constant dense<0.000000e+00> : vector<8x64xf32>
    %10 = tpu.matmul %5, %1, %cst_3 {dimension_numbers = #tpu.dot_dimension_numbers<[1], [0], [0], [1], [0, 0, 1, 1], [], []>} : vector<8x256xbf16>, vector<256x64xbf16>, vector<8x64xf32> -> vector<8x64xf32>
    %11 = arith.addf %9, %10 : vector<8x64xf32>
    %cst_4 = arith.constant dense<0.000000e+00> : vector<8x64xf32>
    %12 = tpu.matmul %8, %1, %cst_4 {dimension_numbers = #tpu.dot_dimension_numbers<[1], [0], [0], [1], [0, 0, 1, 1], [], []>} : vector<8x256xbf16>, vector<256x64xbf16>, vector<8x64xf32> -> vector<8x64xf32>
    %13 = arith.addf %11, %12 : vector<8x64xf32>
    %cst_5 = arith.constant 0.000000e+00 : f32
    %14 = vector.broadcast %cst_5 : f32 to vector<2x4x64xf32>
    %c0_6 = arith.constant 0 : index
    %c4 = arith.constant 4 : index
    %c0_7 = arith.constant 0 : index
    %15 = vector.load %arg3[%c0_6, %c4, %c0_7] : memref<2x8x64xf32, #tpu.memory_space<vmem>>, vector<2x4x64xf32>
    tpu.vector_store %arg3[%c0_6, %c4, %c0_7], %14 {strides = array<i32>} : memref<2x8x64xf32, #tpu.memory_space<vmem>>, vector<2x4x64xf32>,
    %16 = vector.extract_strided_slice %13 {offsets = [0, 0], sizes = [4, 64], strides = [1, 1]} : vector<8x64xf32> to vector<4x64xf32>
    %c0_8 = arith.constant 0 : index
    %c0_9 = arith.constant 0 : index
    %c0_10 = arith.constant 0 : index
    %17 = vector.load %arg3[%c0_8, %c0_9, %c0_10] : memref<2x8x64xf32, #tpu.memory_space<vmem>>, vector<1x4x64xf32>
    %18 = vector.shape_cast %17 : vector<1x4x64xf32> to vector<4x64xf32>
    %19 = vector.shape_cast %16 : vector<4x64xf32> to vector<1x4x64xf32>
    tpu.vector_store %arg3[%c0_8, %c0_9, %c0_10], %19 {strides = array<i32>} : memref<2x8x64xf32, #tpu.memory_space<vmem>>, vector<1x4x64xf32>,
    %20 = vector.extract_strided_slice %13 {offsets = [4, 0], sizes = [4, 64], strides = [1, 1]} : vector<8x64xf32> to vector<4x64xf32>
    %c1 = arith.constant 1 : index
    %c0_11 = arith.constant 0 : index
    %c0_12 = arith.constant 0 : index
    %21 = vector.load %arg3[%c1, %c0_11, %c0_12] : memref<2x8x64xf32, #tpu.memory_space<vmem>>, vector<1x4x64xf32>
    %22 = vector.shape_cast %21 : vector<1x4x64xf32> to vector<4x64xf32>
    %23 = vector.shape_cast %20 : vector<4x64xf32> to vector<1x4x64xf32>
    tpu.vector_store %arg3[%c1, %c0_11, %c0_12], %23 {strides = array<i32>} : memref<2x8x64xf32, #tpu.memory_space<vmem>>, vector<1x4x64xf32>,
    return
  }
  func.func @transform_0(%arg0: i32) -> (i32, i32) {
    %c0_i32 = arith.constant 0 : i32
    %c0_i32_0 = arith.constant 0 : i32
    return %arg0, %c0_i32 : i32, i32
  }
  func.func @transform_1(%arg0: i32) -> (i32, i32) {
    %c0_i32 = arith.constant 0 : i32
    %c0_i32_0 = arith.constant 0 : i32
    %c0_i32_1 = arith.constant 0 : i32
    return %c0_i32, %c0_i32_0 : i32, i32
  }
  func.func @transform_2(%arg0: i32) -> (i32, i32, i32) {
    %c0_i32 = arith.constant 0 : i32
    %c0_i32_0 = arith.constant 0 : i32
    %c0_i32_1 = arith.constant 0 : i32
    return %arg0, %c0_i32, %c0_i32_0 : i32, i32, i32
  }
}

</mosaic_0001>

<bundles_post_ra>
// kernel: downsample_a.1
= control target key start
LH: loop header
LB: loop body
LE: loop exit
PB: predicated region body
PF: predicated region fallthrough
CT: control target
= control target key end

     0   :  { %vm246_vm0 = vcmask 519168   ;;  %v339_v40 = vmov 0.0   ;;  %vm251_vm1 = vcmask 523268   ;;  %s439_s1 = inlined_call_operand.vmem [shape: bf16[256,64], index: 1, kind: input, shape index: {}]   ;;  %s440_s0 = inlined_call_operand.vmem [shape: f32[8,256], index: 0, kind: input, shape index: {}]   ;;  %s441_s2 = inlined_call_operand.vmem [shape: f32[2,8,64], index: 2, kind: output, shape index: {}]  }
   0x1   :  { %v329_v0 = vld [vmem:[%s439_s1 + $0x38] sm:$0xff]  ;;  %v364_v2 = vld [vmem:[%s439_s1 + $0x30] sm:$0xff]  ;;  %v374_v4 = vld [vmem:[%s439_s1 + $0x28] sm:$0xff]  ;;  %247 = vst.msk [vmem:[%s441_s2 + $0x4] sm:$0xf] %vm246_vm0, %v339_v40 }
   0x2   :  { %v337_v1 = vld [vmem:[%s439_s1 + $0x78] sm:$0xff]  ;;  %160 = vmatpush.bf16.msra.mxu0 %v329_v0  ;;  %v369_v3 = vld [vmem:[%s439_s1 + $0x70] sm:$0xff]  ;;  %193 = vmatpush.bf16.msra.mxu2 %v329_v0  ;;  %v335_v5 = vld [vmem:[%s439_s1 + $0x68] sm:$0xff]  ;;  %248 = vst.msk [vmem:[%s441_s2 + $0xc] sm:$0xf] %vm246_vm0, %v339_v40 }
   0x3   :  { %173 = vmatpush.bf16.msra.mxu1 %v337_v1  ;;  %206 = vmatpush.bf16.msra.mxu3 %v337_v1  ;;  %v11_v6 = vld [vmem:[%s440_s0] sm:$0xff]  ;;  %v12_v7 = vld [vmem:[%s440_s0 + $0x8] sm:$0xff]  ;;  %v325_v13 = vld [vmem:[%s439_s1 + $0x18] sm:$0xff] }
   0x4   :  { %v45_v8 = vpack.c.bf16 %v12_v7, %v11_v6  ;;  %v326_v9 = vld [vmem:[%s439_s1 + $0x20] sm:$0xff]  ;;  %v333_v14 = vld [vmem:[%s439_s1 + $0x58] sm:$0xff]  ;;  %v324_v17 = vld [vmem:[%s439_s1 + $0x10] sm:$0xff] }
   0x5   :  { %v334_v10 = vld [vmem:[%s439_s1 + $0x60] sm:$0xff]  ;;  %v332_v18 = vld [vmem:[%s439_s1 + $0x50] sm:$0xff]  ;;  %v323_v20 = vld [vmem:[%s439_s1 + $0x8] sm:$0xff] }
   0x6   :  { %161 = vmatpush.bf16.msra.mxu0 %v364_v2  ;;  %194 = vmatpush.bf16.msra.mxu2 %v364_v2  ;;  %v46_v11 = vunpack.c.l.bf16 %v45_v8  ;;  %v47_v12 = vunpack.c.h.bf16 %v45_v8  ;;  %v331_v21 = vld [vmem:[%s439_s1 + $0x48] sm:$0xff]  ;;  %v322_v24 = vld [vmem:[%s439_s1] sm:$0xff]  ;;  %v187_v26 = vunpack.c.l.b16 %v45_v8  ;;  %v188_v27 = vunpack.c.h.b16 %v45_v8 }
   0x7   :  { %174 = vmatpush.bf16.msra.mxu1 %v369_v3  ;;  %207 = vmatpush.bf16.msra.mxu3 %v369_v3  ;;  %v330_v25 = vld [vmem:[%s439_s1 + $0x40] sm:$0xff] }
   0x8   :  { %v48_v15 = vsub.f32 %v11_v6, %v46_v11  ;;  %v49_v16 = vsub.f32 %v12_v7, %v47_v12  ;;  %v189_v30 = vpack.c.b16 %v187_v26, %v187_v26  ;;  %v190_v31 = vpack.c.b16 %v188_v27, %v188_v27 }
   0xa   :  { %162 = vmatpush.bf16.msra.mxu0 %v374_v4  ;;  %195 = vmatpush.bf16.msra.mxu2 %v374_v4  ;;  %v50_v19 = vpack.c.bf16 %v49_v16, %v48_v15 }
   0xb   :  { %175 = vmatpush.bf16.msra.mxu1 %v335_v5  ;;  %208 = vmatpush.bf16.msra.mxu3 %v335_v5 }
   0xc   :  { %v58_v22 = vunpack.c.l.b16 %v50_v19  ;;  %v59_v23 = vunpack.c.h.b16 %v50_v19  ;;  %v51_v32 = vunpack.c.l.bf16 %v50_v19  ;;  %v52_v33 = vunpack.c.h.bf16 %v50_v19 }
   0xe   :  { %163 = vmatpush.bf16.msra.mxu0 %v326_v9  ;;  %196 = vmatpush.bf16.msra.mxu2 %v326_v9  ;;  %v60_v28 = vpack.c.b16 %v58_v22, %v58_v22  ;;  %v61_v29 = vpack.c.b16 %v59_v23, %v59_v23  ;;  %v53_v34 = vsub.f32 %v48_v15, %v51_v32 }
   0xf   :  { %176 = vmatpush.bf16.msra.mxu1 %v334_v10  ;;  %209 = vmatpush.bf16.msra.mxu3 %v334_v10  ;;  %v54_v35 = vsub.f32 %v49_v16, %v52_v33 }
  0x10   :  { %v55_v36 = vpack.c.bf16 %v53_v34, %v53_v34 }
  0x11   :  { %v56_v37 = vpack.c.bf16 %v54_v35, %v54_v35 }
  0x12   :  { %164 = vmatpush.bf16.msra.mxu0 %v325_v13  ;;  %197 = vmatpush.bf16.msra.mxu2 %v325_v13 }
  0x13   :  { %177 = vmatpush.bf16.msra.mxu1 %v333_v14  ;;  %210 = vmatpush.bf16.msra.mxu3 %v333_v14 }
  0x16   :  { %165 = vmatpush.bf16.msra.mxu0 %v324_v17  ;;  %198 = vmatpush.bf16.msra.mxu2 %v324_v17 }
  0x17   :  { %178 = vmatpush.bf16.msra.mxu1 %v332_v18  ;;  %211 = vmatpush.bf16.msra.mxu3 %v332_v18 }
  0x1a   :  { %166 = vmatpush.bf16.msra.mxu0 %v323_v20  ;;  %199 = vmatpush.bf16.msra.mxu2 %v323_v20 }
  0x1b   :  { %179 = vmatpush.bf16.msra.mxu1 %v331_v21  ;;  %212 = vmatpush.bf16.msra.mxu3 %v331_v21 }
  0x1e   :  { %167 = vmatpush.bf16.msra.mxu0 %v322_v24  ;;  %200 = vmatpush.bf16.msra.mxu2 %v322_v24 }
  0x1f   :  { %180 = vmatpush.bf16.msra.mxu1 %v330_v25  ;;  %213 = vmatpush.bf16.msra.mxu3 %v330_v25 }
  0x21   :  { %168 = vmatmul.bf16.vlgmr.msra.gmra.mxu0 %v60_v28  ;;  %201 = vmatmul.bf16.vlgmr.msra.gmra.mxu2 %v189_v30 }
  0x22   :  { %219 = vmatpush.bf16.msrb.mxu0 %v329_v0  ;;  %181 = vmatmul.bf16.vlgmr.msra.gmra.mxu1 %v61_v29 }
  0x23   :  { %232 = vmatpush.bf16.msrb.mxu1 %v337_v1  ;;  %214 = vmatmul.bf16.vlgmr.msra.gmra.mxu3 %v190_v31 }
  0x26   :  { %220 = vmatpush.bf16.msrb.mxu0 %v364_v2 }
  0x27   :  { %233 = vmatpush.bf16.msrb.mxu1 %v369_v3 }
  0x2a   :  { %221 = vmatpush.bf16.msrb.mxu0 %v374_v4 }
  0x2b   :  { %234 = vmatpush.bf16.msrb.mxu1 %v335_v5 }
  0x2e   :  { %222 = vmatpush.bf16.msrb.mxu0 %v326_v9 }
  0x2f   :  { %235 = vmatpush.bf16.msrb.mxu1 %v334_v10 }
  0x32   :  { %223 = vmatpush.bf16.msrb.mxu0 %v325_v13 }
  0x33   :  { %236 = vmatpush.bf16.msrb.mxu1 %v333_v14 }
  0x36   :  { %224 = vmatpush.bf16.msrb.mxu0 %v324_v17 }
  0x37   :  { %237 = vmatpush.bf16.msrb.mxu1 %v332_v18 }
  0x3a   :  { %225 = vmatpush.bf16.msrb.mxu0 %v323_v20 }
  0x3b   :  { %238 = vmatpush.bf16.msrb.mxu1 %v331_v21 }
  0x3e   :  { %226 = vmatpush.bf16.msrb.mxu0 %v322_v24 }
  0x3f   :  { %239 = vmatpush.bf16.msrb.mxu1 %v330_v25 }
  0x41   :  { %227 = vmatmul.bf16.vlgmr.msrb.gmra.mxu0 %v55_v36 }
  0x42   :  { %240 = vmatmul.bf16.vlgmr.msrb.gmra.mxu1 %v56_v37 }
  0x9e   :  { %v169_v38 = vpop.f32.mrf.mxu0 }
  0x9f   :  { %v182_v39 = vpop.f32.mrf.mxu1 }
  0xa0   :  { %v183_v47 = vadd.f32 %v182_v39, %v169_v38 }
  0xa4   :  { %v202_v43 = vpop.f32.mrf.mxu2 }
  0xa5   :  { %v203_v48 = vadd.f32 %v202_v43, %v183_v47 }
  0xa6   :  { %v171_v41 = vpop.f32.mrf.mxu0  ;;  %v215_v44 = vpop.f32.mrf.mxu3 }
  0xa7   :  { %v184_v42 = vpop.f32.mrf.mxu1  ;;  %v216_v51 = vadd.f32 %v215_v44, %v203_v48 }
  0xac   :  { %v204_v45 = vpop.f32.mrf.mxu2 }
  0xae   :  { %v217_v46 = vpop.f32.mrf.mxu3 }
  0xbe   :  { %v228_v49 = vpop.f32.mrf.mxu0 }
  0xbf   :  { %v241_v50 = vpop.f32.mrf.mxu1 }
  0xc0   :  { %v242_v52 = vadd.f32 %v241_v50, %v228_v49 }
  0xc2   :  { %v245_v53 = vadd.f32 %v242_v52, %v216_v51 }
  0xc4   :  { %249 = vst.msk [vmem:[%s441_s2] sm:$0xf] %vm246_vm0, %v245_v53 }
  0xc5   :  { %321 = vst.msk [vmem:[%s441_s2 + $0x4] sm:$0xf0] %vm251_vm1, %v245_v53 }
  0xc6   :  { %v230_v54 = vpop.f32.mrf.mxu0 }
  0xc7   :  { %v243_v55 = vpop.f32.mrf.mxu1 }

</bundles_post_ra>
